<compile_context>
chip_gen: v7x
topology: tpu7x:2x2x1
jax: 0.10.0
libtpu: 0.0.40
codegen_flags: <defaults>
</compile_context>

<pallas_src>
import jax
import jax.numpy as jnp
from jax import lax
from jax.experimental import pallas as pl
from jax.experimental.pallas import tpu as pltpu

DIM_EMBED = 32
NUM_HEADS = 2
DIM_HEAD = DIM_EMBED // NUM_HEADS
SEQ_LEN = 12

# column offsets inside the packed (E, 3*E) qkv weight
_K_OFF = DIM_EMBED            # 32
_V_OFF = 2 * DIM_EMBED        # 64


def mha_kernel(x_ref, wqkv_ref, bqkv_ref, fcw_ref, fcb_ref, bias_ref, o_ref):
    # x_ref: (BB, S, E) where BB is the per-step batch block (1 or B, static)
    bb = x_ref.shape[0]
    wqkv = wqkv_ref[...]        # (E, 3*E)   scale already folded into the Q block
    bqkv = bqkv_ref[...]        # (1, 3*E)
    fcw = fcw_ref[...]          # (H*Dh, E) = (E, E), pre-transposed
    fcb = fcb_ref[...]          # (1, E)
    bias = bias_ref[...]        # (S, S) additive causal bias: 0 / -1e30

    for b in range(bb):                                     # static unroll
        x = x_ref[b]                                        # (S, E)
        # single fused projection for q/k/v of both heads
        qkv = jnp.dot(x, wqkv, preferred_element_type=jnp.float32) + bqkv  # (S, 3E)

        acc = None
        for h in range(NUM_HEADS):                          # static unroll
            q = qkv[:, h * DIM_HEAD:(h + 1) * DIM_HEAD]                     # (S, Dh), pre-scaled
            k = qkv[:, _K_OFF + h * DIM_HEAD:_K_OFF + (h + 1) * DIM_HEAD]   # (S, Dh)
            v = qkv[:, _V_OFF + h * DIM_HEAD:_V_OFF + (h + 1) * DIM_HEAD]   # (S, Dh)

            # scores: contract last dims (q @ k^T) without an explicit transpose
            s = lax.dot_general(q, k, (((1,), (1,)), ((), ())),
                                preferred_element_type=jnp.float32) + bias  # (S, S)

            # numerically-stable softmax along last axis
            m = jnp.max(s, axis=-1, keepdims=True)
            e = jnp.exp(s - m)
            p = e / jnp.sum(e, axis=-1, keepdims=True)

            head = jnp.dot(p, v, preferred_element_type=jnp.float32)        # (S, Dh)
            # per-head slice of the output projection, accumulated (no concat)
            part = jnp.dot(head, fcw[h * DIM_HEAD:(h + 1) * DIM_HEAD, :],
                           preferred_element_type=jnp.float32)              # (S, E)
            acc = part if acc is None else acc + part

        o_ref[b] = acc + fcb


def multi_head_attention(x, packed_params, *, per_batch_grid=False):
    """per_batch_grid=False -> single grid step (best on 1-TC v5e/v6e).
       per_batch_grid=True  -> grid=(B,) 'parallel' so v7x's 2 TCs split batch."""
    wqkv, bqkv, fcw, fcb, mask_bias = packed_params
    B = x.shape[0]
    bb = 1 if per_batch_grid else B

    return pl.pallas_call(
        mha_kernel,
        out_shape=jax.ShapeDtypeStruct((B, SEQ_LEN, DIM_EMBED), jnp.float32),
        grid=(B // bb,),
        in_specs=[
            pl.BlockSpec((bb, SEQ_LEN, DIM_EMBED), lambda b: (b, 0, 0)),   # x
            pl.BlockSpec((DIM_EMBED, 3 * DIM_EMBED), lambda b: (0, 0)),    # packed Wqkv
            pl.BlockSpec((1, 3 * DIM_EMBED), lambda b: (0, 0)),            # packed bqkv
            pl.BlockSpec((DIM_EMBED, DIM_EMBED), lambda b: (0, 0)),        # fc weight (pre-T)
            pl.BlockSpec((1, DIM_EMBED), lambda b: (0, 0)),                # fc bias
            pl.BlockSpec((SEQ_LEN, SEQ_LEN), lambda b: (0, 0)),            # causal bias
        ],
        out_specs=pl.BlockSpec((bb, SEQ_LEN, DIM_EMBED), lambda b: (b, 0, 0)),
        compiler_params=pltpu.CompilerParams(
            dimension_semantics=("parallel",)),
    )(x, wqkv, bqkv, fcw, fcb, mask_bias)


def init_params(key):
    """Deterministic synthetic parameters (PyTorch-shaped, pre-transposed for x @ W)."""
    ks = jax.random.split(key, 8)
    wq = jax.random.normal(ks[0], (NUM_HEADS, DIM_EMBED, DIM_HEAD), jnp.float32) * 0.1
    bq = jax.random.normal(ks[1], (NUM_HEADS, DIM_HEAD), jnp.float32) * 0.1
    wk = jax.random.normal(ks[2], (NUM_HEADS, DIM_EMBED, DIM_HEAD), jnp.float32) * 0.1
    bk = jax.random.normal(ks[3], (NUM_HEADS, DIM_HEAD), jnp.float32) * 0.1
    wv = jax.random.normal(ks[4], (NUM_HEADS, DIM_EMBED, DIM_HEAD), jnp.float32) * 0.1
    bv = jax.random.normal(ks[5], (NUM_HEADS, DIM_HEAD), jnp.float32) * 0.1
    fcw = jax.random.normal(ks[6], (NUM_HEADS * DIM_HEAD, DIM_EMBED), jnp.float32) * 0.1
    fcb = jax.random.normal(ks[7], (DIM_EMBED,), jnp.float32) * 0.1
    return (wq, bq, wk, bk, wv, bv, fcw, fcb)


def pack_params(params):
    """One-time constant fold: fuse Q/K/V weights of all heads into (E, 3*E),
    fold 1/sqrt(Dh) into the Q block, and build the additive causal bias."""
    wq, bq, wk, bk, wv, bv, fcw, fcb = params
    scale = 1.0 / (DIM_HEAD ** 0.5)

    def flat(w):  # (H, E, Dh) -> (E, H*Dh), head-major columns
        return jnp.transpose(w, (1, 0, 2)).reshape(DIM_EMBED, NUM_HEADS * DIM_HEAD)

    wqkv = jnp.concatenate([flat(wq) * scale, flat(wk), flat(wv)], axis=-1)   # (E, 3E)
    bqkv = jnp.concatenate([bq.reshape(-1) * scale,
                            bk.reshape(-1),
                            bv.reshape(-1)]).reshape(1, 3 * DIM_EMBED)

    row = jnp.arange(SEQ_LEN, dtype=jnp.int32)[:, None]
    col = jnp.arange(SEQ_LEN, dtype=jnp.int32)[None, :]
    mask_bias = jnp.where(col > row, jnp.float32(-1e30), jnp.float32(0.0))    # (S, S)

    return (wqkv, bqkv, fcw, fcb.reshape(1, DIM_EMBED), mask_bias)


def reference(x, params):
    """Pure-JAX reference matching the PyTorch MultiHeadAttention semantics."""
    wq, bq, wk, bk, wv, bv, fcw, fcb = params
    mask = jnp.triu(jnp.ones((SEQ_LEN, SEQ_LEN), bool), k=1)
    heads = []
    for h in range(NUM_HEADS):
        q = x @ wq[h] + bq[h]
        k = x @ wk[h] + bk[h]
        v = x @ wv[h] + bv[h]
        w = (q @ jnp.swapaxes(k, -2, -1)) / (DIM_HEAD ** 0.5)
        w = jnp.where(mask, -jnp.inf, w)
        w = jax.nn.softmax(w, axis=-1)
        heads.append(w @ v)
    return jnp.concatenate(heads, axis=-1) @ fcw + fcb


if __name__ == "__main__":
    key = jax.random.PRNGKey(0)
    kx, kp = jax.random.split(key)
    B = 2
    x = jax.random.normal(kx, (B, SEQ_LEN, DIM_EMBED), jnp.float32)
    params = init_params(kp)
    packed = pack_params(params)
    ref = reference(x, params)

    # Default path: collapsed batch grid (single step) — best on 1-TC v5e/v6e.
    out = multi_head_attention(x, packed)
    jax.block_until_ready(out)
    assert out.shape == (B, SEQ_LEN, DIM_EMBED)
    assert jnp.allclose(out, ref, atol=1e-4, rtol=1e-4)

    # v7x path: grid=(B,) parallel so each TensorCore takes one batch element.
    out2 = multi_head_attention(x, packed, per_batch_grid=True)
    jax.block_until_ready(out2)
    assert jnp.allclose(out2, ref, atol=1e-4, rtol=1e-4)

    print("KERNEL_OK")
</pallas_src>

<mosaic_0001>
module attributes {stable_mosaic.version = 11 : i64} {
  func.func @mha_kernel(%arg0: i32, %arg1: memref<2x12x32xf32, #tpu.memory_space<vmem>>, %arg2: memref<32x96xf32, #tpu.memory_space<vmem>>, %arg3: memref<1x96xf32, #tpu.memory_space<vmem>>, %arg4: memref<32x32xf32, #tpu.memory_space<vmem>>, %arg5: memref<1x32xf32, #tpu.memory_space<vmem>>, %arg6: memref<12x12xf32, #tpu.memory_space<vmem>>, %arg7: memref<2x12x32xf32, #tpu.memory_space<vmem>>) attributes {dimension_semantics = [#tpu.dimension_semantics<parallel>], iteration_bounds = array<i64: 1>, scalar_prefetch = 0 : i64, scratch_operands = 0 : i64, tpu.core_type = #tpu.core_type<tc>, window_params = [{transform_indices = @transform_0, window_bounds = array<i64: 2, 12, 32>}, {pipeline_mode = #tpu.pipeline_mode<synchronous>, transform_indices = @transform_1, window_bounds = array<i64: 32, 96>}, {pipeline_mode = #tpu.pipeline_mode<synchronous>, transform_indices = @transform_2, window_bounds = array<i64: 1, 96>}, {pipeline_mode = #tpu.pipeline_mode<synchronous>, transform_indices = @transform_3, window_bounds = array<i64: 32, 32>}, {pipeline_mode = #tpu.pipeline_mode<synchronous>, transform_indices = @transform_4, window_bounds = array<i64: 1, 32>}, {pipeline_mode = #tpu.pipeline_mode<synchronous>, transform_indices = @transform_5, window_bounds = array<i64: 12, 12>}, {transform_indices = @transform_6, window_bounds = array<i64: 2, 12, 32>}]} {
    %c0 = arith.constant 0 : index
    %c0_0 = arith.constant 0 : index
    %0 = vector.load %arg2[%c0, %c0_0] : memref<32x96xf32, #tpu.memory_space<vmem>>, vector<32x96xf32>
    %c0_1 = arith.constant 0 : index
    %c0_2 = arith.constant 0 : index
    %1 = vector.load %arg3[%c0_1, %c0_2] : memref<1x96xf32, #tpu.memory_space<vmem>>, vector<1x96xf32>
    %c0_3 = arith.constant 0 : index
    %c0_4 = arith.constant 0 : index
    %2 = vector.load %arg4[%c0_3, %c0_4] : memref<32x32xf32, #tpu.memory_space<vmem>>, vector<32x32xf32>
    %c0_5 = arith.constant 0 : index
    %c0_6 = arith.constant 0 : index
    %3 = vector.load %arg5[%c0_5, %c0_6] : memref<1x32xf32, #tpu.memory_space<vmem>>, vector<1x32xf32>
    %c0_7 = arith.constant 0 : index
    %c0_8 = arith.constant 0 : index
    %4 = vector.load %arg6[%c0_7, %c0_8] : memref<12x12xf32, #tpu.memory_space<vmem>>, vector<12x12xf32>
    %c0_9 = arith.constant 0 : index
    %c0_10 = arith.constant 0 : index
    %c0_11 = arith.constant 0 : index
    %5 = vector.load %arg1[%c0_9, %c0_10, %c0_11] : memref<2x12x32xf32, #tpu.memory_space<vmem>>, vector<1x12x32xf32>
    %6 = vector.shape_cast %5 : vector<1x12x32xf32> to vector<12x32xf32>
    %cst = arith.constant dense<0.000000e+00> : vector<12x96xf32>
    %7 = tpu.matmul %6, %0, %cst {dimension_numbers = #tpu.dot_dimension_numbers<[1], [0], [0], [1], [0, 0, 1, 1], [], []>} : vector<12x32xf32>, vector<32x96xf32>, vector<12x96xf32> -> vector<12x96xf32>
    %8 = vector.broadcast %1 : vector<1x96xf32> to vector<12x96xf32>
    %9 = arith.addf %7, %8 : vector<12x96xf32>
    %10 = vector.extract_strided_slice %9 {offsets = [0, 0], sizes = [12, 16], strides = [1, 1]} : vector<12x96xf32> to vector<12x16xf32>
    %11 = vector.extract_strided_slice %9 {offsets = [0, 32], sizes = [12, 16], strides = [1, 1]} : vector<12x96xf32> to vector<12x16xf32>
    %12 = vector.extract_strided_slice %9 {offsets = [0, 64], sizes = [12, 16], strides = [1, 1]} : vector<12x96xf32> to vector<12x16xf32>
    %cst_12 = arith.constant dense<0.000000e+00> : vector<12x12xf32>
    %13 = tpu.matmul %10, %11, %cst_12 {dimension_numbers = #tpu.dot_dimension_numbers<[1], [1], [0], [0], [0, 0, 1, 0], [], []>} : vector<12x16xf32>, vector<12x16xf32>, vector<12x12xf32> -> vector<12x12xf32>
    %14 = arith.addf %13, %4 : vector<12x12xf32>
    %cst_13 = arith.constant dense<0xFF800000> : vector<12xf32>
    %15 = vector.multi_reduction <maximumf>, %14, %cst_13 [1] : vector<12x12xf32> to vector<12xf32>
    %16 = vector.shape_cast %15 : vector<12xf32> to vector<12x1xf32>
    %17 = vector.broadcast %16 : vector<12x1xf32> to vector<12x12xf32>
    %18 = arith.subf %14, %17 : vector<12x12xf32>
    %19 = math.exp %18 : vector<12x12xf32>
    %cst_14 = arith.constant dense<0.000000e+00> : vector<12xf32>
    %20 = vector.multi_reduction <add>, %19, %cst_14 [1] : vector<12x12xf32> to vector<12xf32>
    %21 = vector.shape_cast %20 : vector<12xf32> to vector<12x1xf32>
    %22 = vector.broadcast %21 : vector<12x1xf32> to vector<12x12xf32>
    %23 = arith.divf %19, %22 : vector<12x12xf32>
    %cst_15 = arith.constant dense<0.000000e+00> : vector<12x16xf32>
    %24 = tpu.matmul %23, %12, %cst_15 {dimension_numbers = #tpu.dot_dimension_numbers<[1], [0], [0], [1], [0, 0, 1, 1], [], []>} : vector<12x12xf32>, vector<12x16xf32>, vector<12x16xf32> -> vector<12x16xf32>
    %25 = vector.extract_strided_slice %2 {offsets = [0, 0], sizes = [16, 32], strides = [1, 1]} : vector<32x32xf32> to vector<16x32xf32>
    %cst_16 = arith.constant dense<0.000000e+00> : vector<12x32xf32>
    %26 = tpu.matmul %24, %25, %cst_16 {dimension_numbers = #tpu.dot_dimension_numbers<[1], [0], [0], [1], [0, 0, 1, 1], [], []>} : vector<12x16xf32>, vector<16x32xf32>, vector<12x32xf32> -> vector<12x32xf32>
    %27 = vector.extract_strided_slice %9 {offsets = [0, 16], sizes = [12, 16], strides = [1, 1]} : vector<12x96xf32> to vector<12x16xf32>
    %28 = vector.extract_strided_slice %9 {offsets = [0, 48], sizes = [12, 16], strides = [1, 1]} : vector<12x96xf32> to vector<12x16xf32>
    %29 = vector.extract_strided_slice %9 {offsets = [0, 80], sizes = [12, 16], strides = [1, 1]} : vector<12x96xf32> to vector<12x16xf32>
    %cst_17 = arith.constant dense<0.000000e+00> : vector<12x12xf32>
    %30 = tpu.matmul %27, %28, %cst_17 {dimension_numbers = #tpu.dot_dimension_numbers<[1], [1], [0], [0], [0, 0, 1, 0], [], []>} : vector<12x16xf32>, vector<12x16xf32>, vector<12x12xf32> -> vector<12x12xf32>
    %31 = arith.addf %30, %4 : vector<12x12xf32>
    %cst_18 = arith.constant dense<0xFF800000> : vector<12xf32>
    %32 = vector.multi_reduction <maximumf>, %31, %cst_18 [1] : vector<12x12xf32> to vector<12xf32>
    %33 = vector.shape_cast %32 : vector<12xf32> to vector<12x1xf32>
    %34 = vector.broadcast %33 : vector<12x1xf32> to vector<12x12xf32>
    %35 = arith.subf %31, %34 : vector<12x12xf32>
    %36 = math.exp %35 : vector<12x12xf32>
    %cst_19 = arith.constant dense<0.000000e+00> : vector<12xf32>
    %37 = vector.multi_reduction <add>, %36, %cst_19 [1] : vector<12x12xf32> to vector<12xf32>
    %38 = vector.shape_cast %37 : vector<12xf32> to vector<12x1xf32>
    %39 = vector.broadcast %38 : vector<12x1xf32> to vector<12x12xf32>
    %40 = arith.divf %36, %39 : vector<12x12xf32>
    %cst_20 = arith.constant dense<0.000000e+00> : vector<12x16xf32>
    %41 = tpu.matmul %40, %29, %cst_20 {dimension_numbers = #tpu.dot_dimension_numbers<[1], [0], [0], [1], [0, 0, 1, 1], [], []>} : vector<12x12xf32>, vector<12x16xf32>, vector<12x16xf32> -> vector<12x16xf32>
    %42 = vector.extract_strided_slice %2 {offsets = [16, 0], sizes = [16, 32], strides = [1, 1]} : vector<32x32xf32> to vector<16x32xf32>
    %cst_21 = arith.constant dense<0.000000e+00> : vector<12x32xf32>
    %43 = tpu.matmul %41, %42, %cst_21 {dimension_numbers = #tpu.dot_dimension_numbers<[1], [0], [0], [1], [0, 0, 1, 1], [], []>} : vector<12x16xf32>, vector<16x32xf32>, vector<12x32xf32> -> vector<12x32xf32>
    %44 = arith.addf %26, %43 : vector<12x32xf32>
    %45 = vector.broadcast %3 : vector<1x32xf32> to vector<12x32xf32>
    %46 = arith.addf %44, %45 : vector<12x32xf32>
    %c0_22 = arith.constant 0 : index
    %c0_23 = arith.constant 0 : index
    %c0_24 = arith.constant 0 : index
    %47 = vector.load %arg7[%c0_22, %c0_23, %c0_24] : memref<2x12x32xf32, #tpu.memory_space<vmem>>, vector<1x12x32xf32>
    %48 = vector.shape_cast %47 : vector<1x12x32xf32> to vector<12x32xf32>
    %49 = vector.shape_cast %46 : vector<12x32xf32> to vector<1x12x32xf32>
    tpu.vector_store %arg7[%c0_22, %c0_23, %c0_24], %49 {strides = array<i32>} : memref<2x12x32xf32, #tpu.memory_space<vmem>>, vector<1x12x32xf32>,
    %c1 = arith.constant 1 : index
    %c0_25 = arith.constant 0 : index
    %c0_26 = arith.constant 0 : index
    %50 = vector.load %arg1[%c1, %c0_25, %c0_26] : memref<2x12x32xf32, #tpu.memory_space<vmem>>, vector<1x12x32xf32>
    %51 = vector.shape_cast %50 : vector<1x12x32xf32> to vector<12x32xf32>
    %cst_27 = arith.constant dense<0.000000e+00> : vector<12x96xf32>
    %52 = tpu.matmul %51, %0, %cst_27 {dimension_numbers = #tpu.dot_dimension_numbers<[1], [0], [0], [1], [0, 0, 1, 1], [], []>} : vector<12x32xf32>, vector<32x96xf32>, vector<12x96xf32> -> vector<12x96xf32>
    %53 = vector.broadcast %1 : vector<1x96xf32> to vector<12x96xf32>
    %54 = arith.addf %52, %53 : vector<12x96xf32>
    %55 = vector.extract_strided_slice %54 {offsets = [0, 0], sizes = [12, 16], strides = [1, 1]} : vector<12x96xf32> to vector<12x16xf32>
    %56 = vector.extract_strided_slice %54 {offsets = [0, 32], sizes = [12, 16], strides = [1, 1]} : vector<12x96xf32> to vector<12x16xf32>
    %57 = vector.extract_strided_slice %54 {offsets = [0, 64], sizes = [12, 16], strides = [1, 1]} : vector<12x96xf32> to vector<12x16xf32>
    %cst_28 = arith.constant dense<0.000000e+00> : vector<12x12xf32>
    %58 = tpu.matmul %55, %56, %cst_28 {dimension_numbers = #tpu.dot_dimension_numbers<[1], [1], [0], [0], [0, 0, 1, 0], [], []>} : vector<12x16xf32>, vector<12x16xf32>, vector<12x12xf32> -> vector<12x12xf32>
    %59 = arith.addf %58, %4 : vector<12x12xf32>
    %cst_29 = arith.constant dense<0xFF800000> : vector<12xf32>
    %60 = vector.multi_reduction <maximumf>, %59, %cst_29 [1] : vector<12x12xf32> to vector<12xf32>
    %61 = vector.shape_cast %60 : vector<12xf32> to vector<12x1xf32>
    %62 = vector.broadcast %61 : vector<12x1xf32> to vector<12x12xf32>
    %63 = arith.subf %59, %62 : vector<12x12xf32>
    %64 = math.exp %63 : vector<12x12xf32>
    %cst_30 = arith.constant dense<0.000000e+00> : vector<12xf32>
    %65 = vector.multi_reduction <add>, %64, %cst_30 [1] : vector<12x12xf32> to vector<12xf32>
    %66 = vector.shape_cast %65 : vector<12xf32> to vector<12x1xf32>
    %67 = vector.broadcast %66 : vector<12x1xf32> to vector<12x12xf32>
    %68 = arith.divf %64, %67 : vector<12x12xf32>
    %cst_31 = arith.constant dense<0.000000e+00> : vector<12x16xf32>
    %69 = tpu.matmul %68, %57, %cst_31 {dimension_numbers = #tpu.dot_dimension_numbers<[1], [0], [0], [1], [0, 0, 1, 1], [], []>} : vector<12x12xf32>, vector<12x16xf32>, vector<12x16xf32> -> vector<12x16xf32>
    %70 = vector.extract_strided_slice %2 {offsets = [0, 0], sizes = [16, 32], strides = [1, 1]} : vector<32x32xf32> to vector<16x32xf32>
    %cst_32 = arith.constant dense<0.000000e+00> : vector<12x32xf32>
    %71 = tpu.matmul %69, %70, %cst_32 {dimension_numbers = #tpu.dot_dimension_numbers<[1], [0], [0], [1], [0, 0, 1, 1], [], []>} : vector<12x16xf32>, vector<16x32xf32>, vector<12x32xf32> -> vector<12x32xf32>
    %72 = vector.extract_strided_slice %54 {offsets = [0, 16], sizes = [12, 16], strides = [1, 1]} : vector<12x96xf32> to vector<12x16xf32>
    %73 = vector.extract_strided_slice %54 {offsets = [0, 48], sizes = [12, 16], strides = [1, 1]} : vector<12x96xf32> to vector<12x16xf32>
    %74 = vector.extract_strided_slice %54 {offsets = [0, 80], sizes = [12, 16], strides = [1, 1]} : vector<12x96xf32> to vector<12x16xf32>
    %cst_33 = arith.constant dense<0.000000e+00> : vector<12x12xf32>
    %75 = tpu.matmul %72, %73, %cst_33 {dimension_numbers = #tpu.dot_dimension_numbers<[1], [1], [0], [0], [0, 0, 1, 0], [], []>} : vector<12x16xf32>, vector<12x16xf32>, vector<12x12xf32> -> vector<12x12xf32>
    %76 = arith.addf %75, %4 : vector<12x12xf32>
    %cst_34 = arith.constant dense<0xFF800000> : vector<12xf32>
    %77 = vector.multi_reduction <maximumf>, %76, %cst_34 [1] : vector<12x12xf32> to vector<12xf32>
    %78 = vector.shape_cast %77 : vector<12xf32> to vector<12x1xf32>
    %79 = vector.broadcast %78 : vector<12x1xf32> to vector<12x12xf32>
    %80 = arith.subf %76, %79 : vector<12x12xf32>
    %81 = math.exp %80 : vector<12x12xf32>
    %cst_35 = arith.constant dense<0.000000e+00> : vector<12xf32>
    %82 = vector.multi_reduction <add>, %81, %cst_35 [1] : vector<12x12xf32> to vector<12xf32>
    %83 = vector.shape_cast %82 : vector<12xf32> to vector<12x1xf32>
    %84 = vector.broadcast %83 : vector<12x1xf32> to vector<12x12xf32>
    %85 = arith.divf %81, %84 : vector<12x12xf32>
    %cst_36 = arith.constant dense<0.000000e+00> : vector<12x16xf32>
    %86 = tpu.matmul %85, %74, %cst_36 {dimension_numbers = #tpu.dot_dimension_numbers<[1], [0], [0], [1], [0, 0, 1, 1], [], []>} : vector<12x12xf32>, vector<12x16xf32>, vector<12x16xf32> -> vector<12x16xf32>
    %87 = vector.extract_strided_slice %2 {offsets = [16, 0], sizes = [16, 32], strides = [1, 1]} : vector<32x32xf32> to vector<16x32xf32>
    %cst_37 = arith.constant dense<0.000000e+00> : vector<12x32xf32>
    %88 = tpu.matmul %86, %87, %cst_37 {dimension_numbers = #tpu.dot_dimension_numbers<[1], [0], [0], [1], [0, 0, 1, 1], [], []>} : vector<12x16xf32>, vector<16x32xf32>, vector<12x32xf32> -> vector<12x32xf32>
    %89 = arith.addf %71, %88 : vector<12x32xf32>
    %90 = vector.broadcast %3 : vector<1x32xf32> to vector<12x32xf32>
    %91 = arith.addf %89, %90 : vector<12x32xf32>
    %c1_38 = arith.constant 1 : index
    %c0_39 = arith.constant 0 : index
    %c0_40 = arith.constant 0 : index
    %92 = vector.load %arg7[%c1_38, %c0_39, %c0_40] : memref<2x12x32xf32, #tpu.memory_space<vmem>>, vector<1x12x32xf32>
    %93 = vector.shape_cast %92 : vector<1x12x32xf32> to vector<12x32xf32>
    %94 = vector.shape_cast %91 : vector<12x32xf32> to vector<1x12x32xf32>
    tpu.vector_store %arg7[%c1_38, %c0_39, %c0_40], %94 {strides = array<i32>} : memref<2x12x32xf32, #tpu.memory_space<vmem>>, vector<1x12x32xf32>,
    return
  }
  func.func @transform_0(%arg0: i32) -> (i32, i32, i32) {
    %c0_i32 = arith.constant 0 : i32
    %c0_i32_0 = arith.constant 0 : i32
    %c0_i32_1 = arith.constant 0 : i32
    return %arg0, %c0_i32, %c0_i32_0 : i32, i32, i32
  }
  func.func @transform_1(%arg0: i32) -> (i32, i32) {
    %c0_i32 = arith.constant 0 : i32
    %c0_i32_0 = arith.constant 0 : i32
    %c0_i32_1 = arith.constant 0 : i32
    return %c0_i32, %c0_i32_0 : i32, i32
  }
  func.func @transform_2(%arg0: i32) -> (i32, i32) {
    %c0_i32 = arith.constant 0 : i32
    %c0_i32_0 = arith.constant 0 : i32
    %c0_i32_1 = arith.constant 0 : i32
    return %c0_i32, %c0_i32_0 : i32, i32
  }
  func.func @transform_3(%arg0: i32) -> (i32, i32) {
    %c0_i32 = arith.constant 0 : i32
    %c0_i32_0 = arith.constant 0 : i32
    %c0_i32_1 = arith.constant 0 : i32
    return %c0_i32, %c0_i32_0 : i32, i32
  }
  func.func @transform_4(%arg0: i32) -> (i32, i32) {
    %c0_i32 = arith.constant 0 : i32
    %c0_i32_0 = arith.constant 0 : i32
    %c0_i32_1 = arith.constant 0 : i32
    return %c0_i32, %c0_i32_0 : i32, i32
  }
  func.func @transform_5(%arg0: i32) -> (i32, i32) {
    %c0_i32 = arith.constant 0 : i32
    %c0_i32_0 = arith.constant 0 : i32
    %c0_i32_1 = arith.constant 0 : i32
    return %c0_i32, %c0_i32_0 : i32, i32
  }
  func.func @transform_6(%arg0: i32) -> (i32, i32, i32) {
    %c0_i32 = arith.constant 0 : i32
    %c0_i32_0 = arith.constant 0 : i32
    %c0_i32_1 = arith.constant 0 : i32
    return %arg0, %c0_i32, %c0_i32_0 : i32, i32, i32
  }
}

</mosaic_0001>

<bundles_post_ra>
// kernel: tpu_custom_call.1
= control target key start
LH: loop header
LB: loop body
LE: loop exit
PB: predicated region body
PF: predicated region fallthrough
CT: control target
= control target key end

     0   :  { %11 = vsyncpa [#allocation3], 0  ;;  %s1773_s21 = smov [#allocation2]   ;;  %s2056_s0 = inlined_call_operand.vmem [shape: f32[2,12,32], index: 0, kind: input, shape index: {}]   ;;  %s2057_s1 = inlined_call_operand.vmem [shape: f32[32,96], index: 1, kind: input, shape index: {}]   ;;  %s2058_s2 = inlined_call_operand.vmem [shape: f32[1,96], index: 2, kind: input, shape index: {}]   ;;  %s2059_s3 = inlined_call_operand.vmem [shape: f32[32,32], index: 3, kind: input, shape index: {}]   ;;  %s2060_s4 = inlined_call_operand.vmem [shape: f32[1,32], index: 4, kind: input, shape index: {}]   ;;  %s2061_s5 = inlined_call_operand.hbm [shape: f32[12,12], index: 5, kind: input, shape index: {}]   ;;  %s2062_s6 = inlined_call_operand.vmem [shape: f32[2,12,32], index: 6, kind: output, shape index: {}]  }
   0x1   :  { %s27_s22 = sshll.u32 %s1773_s21, 4  ;;  %s1749_s25 = scalar_lea.hbm %s2061_s5, 256  ;;  %s28_s22 = int_to_ptr.vmem [resolvable:$true] %s27_s22 }
   0x2   :  { %p1750_p0 = scmp.ne.s32.totalorder %s2061_s5, %s1749_s25  ;;  %p1753_p1 = scmp.lt.u32.totalorder %s1749_s25, %s2061_s5 }
   0x4   :  { %p1755_p2 = pnand %p1753_p1, %p1750_p0 }
   0x6   :  { %1758 = shalt.err (!%p1755_p2)
}
   0x7   :  { %s1759_s30 = scalar_lea.vmem %s28_s22, 256  ;;  %p1764_p4 = scmp.lt.s32.totalorder %s28_s22, %s28_s22 }
   0x8   :  { %p1760_p3 = scmp.ne.s32.totalorder %s28_s22, %s1759_s30  ;;  %p1765_p5 = scmp.lt.s32.totalorder %s1759_s30, %s1759_s30 }
   0xa   :  { %p1766_p6 = por %p1765_p5, %p1764_p4 }
   0xc   :  { %p1767_p7 = pnand %p1766_p6, %p1760_p3 }
   0xe   :  { %1770 = shalt.err (!%p1767_p7)
}
   0xf   :  { %s1774_s7 = smov 128   ;;  %s1775_s8 = smov 8  }
  0x10   :  { %33 = dma.hbm_to_vmem [thread:$0]  %s2061_s5, 256, %s28_s22, [#allocation3], %s1774_s7, %s1774_s7, %s1775_s8  }
  0x11   :  { %1771 = dma.done.wait [#allocation3], 256  }
  0x12   :  { %1772 = vsyncadd [#allocation3], 4294967040  ;;  %vm57_vm0 = vcmask 261120   ;;  %v37_v0 = vld [vmem:[%s2057_s1] sm:$0xff]  ;;  %v38_v1 = vld [vmem:[%s2057_s1 + $0x8] sm:$0xff]  ;;  %vm145_vm1 = vcmask 130048  }
  0x13   :  { %v39_v2 = vld [vmem:[%s2057_s1 + $0x10] sm:$0xff]  ;;  %v1838_v3 = vpack.c.bf16 %v38_v1, %v37_v0  ;;  %v40_v4 = vld [vmem:[%s2057_s1 + $0x18] sm:$0xff]  ;;  %v49_v5 = vld [vmem:[%s2056_s0] sm:$0xff]  ;;  %s1776_s23 = smov 96   ;;  %vm233_vm3 = vcmask 93184   ;;  %vm229_vm4 = vcmask 97280  }
  0x14   :  { %v1846_v6 = vpack.c.bf16 %v40_v4, %v39_v2  ;;  %1486 = vmatprep.mubr.msk.f32.mxu0 %vm57_vm0, %v49_v5  ;;  %v50_v7 = vld [vmem:[%s2056_s0 + $0x8] sm:$0xf]  ;;  %v1860_v8 = vld [vmem:[%s2058_s2] ss:$0 sm:$0xff]  ;;  %vm1871_vm2 = vmpackc.low %vm145_vm1, %vm145_vm1  ;;  %s1777_s2 = smov 64   ;;  %s1778_s24 = smov 80  }
  0x15   :  { %1585 = vmatprep.subr.bf16.mxu0 %v1838_v3  ;;  %v1880_v19 = vld [vmem:[#allocation2 + $0x8] sm:$0xf]  ;;  %v1882_v20 = vld [vmem:[#allocation2] sm:$0xff]  ;;  %s1779_s25 = smov 112   ;;  %vm264_vm5 = vcmask 1043456   ;;  %vm1780_vm6 = vmmov 1  }
  0x16   :  { %1587 = vmatpush3.bf16.msra.mxu0 %v1838_v3  ;;  %vm1893_vm7 = vmpackc.low %vm264_vm5, %vm1780_vm6  ;;  %v1394_v62 = vld [vmem:[%s2056_s0 + $0x10] sm:$0xff]  ;;  %v1395_v63 = vld [vmem:[%s2056_s0 + $0x18] sm:$0xf]  ;;  %s1781_s0 = smov 48   ;;  %vm714_vm8 = vcmask 257024  }
  0x17   :  { %1589 = vmatprep.subr.bf16.mxu0 %v1846_v6 }
  0x1a   :  { %1591 = vmatpush3.bf16.msra.mxu0 %v1846_v6 }
  0x1d   :  { %1487 = vmatmul.mubr.msk.f32.vlgmr.msra.gmra.mrb[0].mxu0 %vm57_vm0, %v50_v7 }
  0xf0   :  { %v1488_v9 = vpop.f32.mrb[0].mxu0 }
  0xf1   :  { %v136_v10 = vadd.f32 %v1488_v9, %v1860_v8  ;;  %v130_v11 = vpop.f32.mrb[1].mxu0 }
  0xf2   :  { %v131_v12 = vadd.f32 %v1860_v8, %v130_v11 }
  0xf4   :  { %1493 = vmatprep.mubr.msk.f32.mxu1 %vm145_vm1, %v131_v12  ;;  %v1865_v13 = vpack.i.bf16 %v136_v10, %v131_v12 }
  0xf6   :  { %1678 = vrot.lane.b32.xlu0 %v1865_v13, %s1776_s23 }
 0x168   :  { %v1679_v14 = vpop.permute.xlu0 %1678 }
 0x169   :  { %v1681_v15 = vunpack.i.h.bf16 %v1679_v14  ;;  %v1680_v16 = vunpack.i.l.bf16 %v1679_v14 }
 0x16b   :  { %v1592_v18 = vpack.c.bf16 %v1681_v15, %v1680_v16 }
 0x16d   :  { %1594 = vmatprep.subr.msk.bf16.mxu1 %vm1871_vm2, %v1592_v18 }
 0x16e   :  { %1597 = vmatpush3.bf16.xpose.msk.msra.mxu1 %vm1871_vm2, %v1592_v18 }
 0x175   :  { %1494 = vmatmul.mubr.msk.f32.vlgmr.msra.gmra.mrb[0].mxu1 %vm145_vm1, %v136_v10 }
 0x248   :  { %v1495_v21 = vpop.f32.mrb[0].mxu1 }
 0x249   :  { %v226_v22 = vadd.f32 %v1495_v21, %v1880_v19  ;;  %v220_v23 = vpop.f32.mrb[1].mxu1 }
 0x24a   :  { %v221_v24 = vadd.f32 %v220_v23, %v1882_v20 }
 0x24b   :  { %v234_v25 = vsel %vm233_vm3, %v226_v22, -inf }
 0x24c   :  { %235 = vmax.xlane.f32.xlu1 %v234_v25  ;;  %v230_v26 = vsel %vm229_vm4, %v221_v24, -inf }
 0x24d   :  { %231 = vmax.xlane.f32.xlu0 %v230_v26 }
 0x25d   :  { %1683 = vrot.lane.b32.xlu1 %v1865_v13, %s1777_s2 }
 0x261   :  { %1688 = vrot.lane.b32.xlu1 %v1865_v13, %s1778_s24 }
 0x263   :  { %344 = vrot.lane.b32.xlu0 %v136_v10, %s1779_s25 }
 0x2d9   :  { %v236_v27 = vpop.xlane.xlu1 %235 }
 0x2da   :  { %v238_v28 = vsub.f32 %v226_v22, %v236_v27  ;;  %v232_v29 = vpop.xlane.xlu0 %231 }
 0x2db   :  { %v237_v30 = vsub.f32 %v221_v24, %v232_v29 }
 0x2dc   :  { %v241_v31 = vmul.f32 1.442695, %v238_v28 }
 0x2dd   :  { %v239_v32 = vmul.f32 1.442695, %v237_v30  ;;  %v1684_v33 = vpop.permute.xlu1 %1683 }
 0x2de   :  { %1717 = vpow2.f32 %v241_v31  ;;  %v1686_v34 = vunpack.i.h.bf16 %v1684_v33  ;;  %v1685_v35 = vunpack.i.l.bf16 %v1684_v33  ;;  %v345_v53 = vpop.permute.xlu0 %344  ;;  %v42_v31 = vld [vmem:[%s2059_s3] sm:$0xff] }
 0x2df   :  { %1719 = vpow2.f32 %v239_v32  ;;  %v43_v32 = vld [vmem:[%s2059_s3 + $0x8] sm:$0xff] }
 0x2e0   :  { %v1598_v37 = vpack.c.bf16 %v1686_v34, %v1685_v35  ;;  %v1967_v33 = vpack.c.bf16 %v43_v32, %v42_v31 }
 0x2e1   :  { %v1689_v38 = vpop.permute.xlu1 %1688 }
 0x2e2   :  { %v1691_v39 = vunpack.i.h.bf16 %v1689_v38  ;;  %v1690_v40 = vunpack.i.l.bf16 %v1689_v38  ;;  %1600 = vmatprep.subr.msk.bf16.mxu1 %vm1893_vm7, %v1598_v37 }
 0x2e3   :  { %1603 = vmatpush3.bf16.msk.msra.mxu1 %vm1893_vm7, %v1598_v37 }
 0x2e4   :  { %v1604_v41 = vpack.c.bf16 %v1691_v39, %v1690_v40 }
 0x2e6   :  { %1606 = vmatprep.subr.msk.bf16.mxu1 %vm1871_vm2, %v1604_v41 }
 0x2e8   :  { %v1718_v42 = vpop.eup %1717 }
 0x2e9   :  { %v246_v43 = vsel %vm233_vm3, %v1718_v42, 0.0  ;;  %v1720_v44 = vpop.eup %1719 }
 0x2ea   :  { %247 = vadd.xlane.f32.xlu1 %v246_v43  ;;  %v243_v45 = vsel %vm229_vm4, %v1720_v44, 0.0 }
 0x2ee   :  { %244 = vadd.xlane.f32.xlu1 %v243_v45 }
 0x2ff   :  { %342 = vrot.lane.b32.xlu1 %v131_v12, %s1779_s25 }
 0x377   :  { %v248_v46 = vpop.xlane.xlu1 %247 }
 0x378   :  { %1721 = vrcp.f32 %v248_v46 }
 0x37b   :  { %v245_v47 = vpop.xlane.xlu1 %244 }
 0x37c   :  { %1723 = vrcp.f32 %v245_v47 }
 0x37f   :  { %v343_v52 = vpop.permute.xlu1 %342 }
 0x382   :  { %v1722_v48 = vpop.eup %1721 }
 0x383   :  { %v252_v51 = vmul.f32 %v1722_v48, %v1718_v42 }
 0x386   :  { %v1724_v49 = vpop.eup %1723 }
 0x387   :  { %v250_v50 = vmul.f32 %v1724_v49, %v1720_v44 }
 0x389   :  { %1500 = vmatprep.mubr.msk.f32.mxu1 %vm229_vm4, %v250_v50 }
 0x38a   :  { %1501 = vmatmul.mubr.msk.f32.vlgmr.msra.gmra.mrb[2].mxu1 %vm229_vm4, %v252_v51 }
 0x38b   :  { %1609 = vmatpush3.bf16.xpose.msk.msra.mxu1 %vm1871_vm2, %v1604_v41  ;;  %1507 = vmatprep.mubr.msk.f32.mxu1 %vm145_vm1, %v343_v52  ;;  %v1987_v41 = vld [vmem:[%s2060_s4] ss:$0 sm:$0xff] }
 0x38c   :  { %1625 = vmatprep.subr.bf16.mxu1 %v1838_v3 }
 0x392   :  { %1508 = vmatmul.mubr.msk.f32.vlgmr.msra.gmra.mrb[4].mxu1 %vm145_vm1, %v345_v53 }
 0x393   :  { %1627 = vmatpush3.bf16.msra.mxu1 %v1838_v3  ;;  %1539 = vmatprep.mubr.msk.f32.mxu1 %vm57_vm0, %v1394_v62 }
 0x394   :  { %1629 = vmatprep.subr.bf16.mxu1 %v1846_v6 }
 0x397   :  { %1631 = vmatpush3.bf16.msra.mxu1 %v1846_v6 }
 0x39a   :  { %1540 = vmatmul.mubr.msk.f32.vlgmr.msra.gmra.mrb[6].mxu1 %vm57_vm0, %v1395_v63 }
 0x45d   :  { %v1916_v54 = vpop.f32.mrb[2].mxu1 }
 0x45e   :  { %v1918_v55 = vpop.f32.mrb[3].mxu1 }
 0x465   :  { %v1509_v56 = vpop.f32.mrb[4].mxu1 }
 0x466   :  { %v430_v57 = vadd.f32 %v1509_v56, %v1880_v19  ;;  %v424_v58 = vpop.f32.mrb[5].mxu1 }
 0x467   :  { %v425_v59 = vadd.f32 %v424_v58, %v1882_v20 }
 0x468   :  { %v436_v60 = vsel %vm233_vm3, %v430_v57, -inf }
 0x469   :  { %437 = vmax.xlane.f32.xlu0 %v436_v60  ;;  %v433_v61 = vsel %vm229_vm4, %v425_v59, -inf }
 0x46a   :  { %434 = vmax.xlane.f32.xlu1 %v433_v61 }
 0x46d   :  { %v1541_v11 = vpop.f32.mrb[6].mxu1 }
 0x46e   :  { %v797_v12 = vadd.f32 %v1541_v11, %v1860_v8  ;;  %v791_v14 = vpop.f32.mrb[7].mxu1 }
 0x46f   :  { %v1938_v15 = vadd.f32 %v1860_v8, %v791_v14  ;;  %v45_v8 = vld [vmem:[%s2059_s3 + $0x18] sm:$0xff] }
 0x471   :  { %v1941_v16 = vpack.i.bf16 %v797_v12, %v1938_v15 }
 0x47f   :  { %1698 = vrot.lane.b32.xlu0 %v1941_v16, %s1776_s23 }
 0x4f6   :  { %v438_v0 = vpop.xlane.xlu0 %437 }
 0x4f7   :  { %v440_v1 = vsub.f32 %v430_v57, %v438_v0  ;;  %v435_v2 = vpop.xlane.xlu1 %434 }
 0x4f8   :  { %v439_v3 = vsub.f32 %v425_v59, %v435_v2 }
 0x4f9   :  { %v443_v4 = vmul.f32 1.442695, %v440_v1 }
 0x4fa   :  { %v441_v5 = vmul.f32 1.442695, %v439_v3  ;;  %v1699_v34 = vpop.permute.xlu0 %1698 }
 0x4fb   :  { %1725 = vpow2.f32 %v443_v4  ;;  %v1701_v35 = vunpack.i.h.bf16 %v1699_v34  ;;  %v1700_v37 = vunpack.i.l.bf16 %v1699_v34 }
 0x4fc   :  { %1727 = vpow2.f32 %v441_v5 }
 0x4fd   :  { %v1632_v40 = vpack.c.bf16 %v1701_v35, %v1700_v37 }
 0x505   :  { %v1726_v6 = vpop.eup %1725 }
 0x506   :  { %v448_v7 = vsel %vm233_vm3, %v1726_v6, 0.0  ;;  %v1728_v9 = vpop.eup %1727 }
 0x507   :  { %449 = vadd.xlane.f32.xlu1 %v448_v7  ;;  %v445_v10 = vsel %vm229_vm4, %v1728_v9, 0.0 }
 0x50b   :  { %446 = vadd.xlane.f32.xlu1 %v445_v10 }
 0x51c   :  { %1693 = vrot.lane.b32.xlu1 %v1865_v13, %s1781_s0  ;;  %v44_v13 = vld [vmem:[%s2059_s3 + $0x10] sm:$0xff] }
 0x51d   :  { %v1951_v26 = vpack.c.bf16 %v45_v8, %v44_v13 }
 0x594   :  { %v450_v18 = vpop.xlane.xlu1 %449 }
 0x595   :  { %1729 = vrcp.f32 %v450_v18 }
 0x598   :  { %v447_v21 = vpop.xlane.xlu1 %446 }
 0x599   :  { %1731 = vrcp.f32 %v447_v21 }
 0x59c   :  { %v1694_v22 = vpop.permute.xlu1 %1693 }
 0x59d   :  { %v1696_v23 = vunpack.i.h.bf16 %v1694_v22  ;;  %v1695_v24 = vunpack.i.l.bf16 %v1694_v22 }
 0x59f   :  { %v1610_v25 = vpack.c.bf16 %v1696_v23, %v1695_v24  ;;  %v1730_v27 = vpop.eup %1729 }
 0x5a0   :  { %v454_v30 = vmul.f32 %v1730_v27, %v1726_v6 }
 0x5a1   :  { %1612 = vmatprep.subr.msk.bf16.mxu0 %vm1893_vm7, %v1610_v25 }
 0x5a2   :  { %1615 = vmatpush3.bf16.msk.msra.mxu0 %vm1893_vm7, %v1610_v25 }
 0x5a3   :  { %v1732_v28 = vpop.eup %1731  ;;  %1617 = vmatprep.subr.bf16.mxu0 %v1951_v26 }
 0x5a4   :  { %v452_v29 = vmul.f32 %v1732_v28, %v1728_v9 }
 0x5a6   :  { %1514 = vmatprep.mubr.msk.f32.mxu0 %vm229_vm4, %v452_v29 }
 0x5a7   :  { %1515 = vmatmul.mubr.msk.f32.vlgmr.msra.gmra.mrb[2].mxu0 %vm229_vm4, %v454_v30 }
 0x5a8   :  { %1619 = vmatpush3.bf16.msra.mxu0 %v1951_v26 }
 0x5a9   :  { %1621 = vmatprep.subr.bf16.mxu0 %v1967_v33 }
 0x67a   :  { %v1516_v38 = vpop.f32.mrb[2].mxu0 }
 0x67b   :  { %v534_v39 = vpop.f32.mrb[3].mxu0 }
 0x67c   :  { %1521 = vmatprep.mubr.msk.f32.mxu0 %vm145_vm1, %v534_v39 }
 0x67d   :  { %1522 = vmatmul.mubr.msk.f32.vlgmr.msra.gmra.mrb[4].mxu0 %vm145_vm1, %v1516_v38 }
 0x67e   :  { %1623 = vmatpush3.bf16.msra.mxu0 %v1967_v33  ;;  %1528 = vmatprep.mubr.msk.f32.mxu0 %vm145_vm1, %v1918_v55 }
 0x67f   :  { %1634 = vmatprep.subr.msk.bf16.mxu0 %vm1871_vm2, %v1632_v40 }
 0x685   :  { %1529 = vmatmul.mubr.msk.f32.vlgmr.msra.gmra.mrb[4].mxu0 %vm145_vm1, %v1916_v54 }
 0x686   :  { %1546 = vmatprep.mubr.msk.f32.mxu0 %vm145_vm1, %v1938_v15 }
 0x687   :  { %1637 = vmatpush3.bf16.xpose.msk.msra.mxu0 %vm1871_vm2, %v1632_v40 }
 0x68e   :  { %1547 = vmatmul.mubr.msk.f32.vlgmr.msra.gmra.mrb[6].mxu0 %vm145_vm1, %v797_v12 }
 0x758   :  { %v1530_v42 = vpop.f32.mrb[4].mxu0 }
 0x759   :  { %v712_v43 = vadd.f32 %v1530_v42, %v1987_v41  ;;  %v696_v44 = vpop.f32.mrb[5].mxu0 }
 0x75a   :  { %v711_v45 = vadd.f32 %v1987_v41, %v696_v44 }
 0x75b   :  { %715 = vst.msk [vmem:[%s2062_s6 + $0x8] sm:$0xf] %vm714_vm8, %v712_v43 }
 0x75c   :  { %713 = vst.msk [vmem:[%s2062_s6] sm:$0xff] %vm57_vm0, %v711_v45 }
 0x761   :  { %v1548_v46 = vpop.f32.mrb[6].mxu0 }
 0x762   :  { %v886_v47 = vadd.f32 %v1548_v46, %v1880_v19  ;;  %v880_v48 = vpop.f32.mrb[7].mxu0 }
 0x763   :  { %v881_v49 = vadd.f32 %v880_v48, %v1882_v20 }
 0x764   :  { %v892_v50 = vsel %vm233_vm3, %v886_v47, -inf }
 0x765   :  { %893 = vmax.xlane.f32.xlu0 %v892_v50  ;;  %v889_v51 = vsel %vm229_vm4, %v881_v49, -inf }
 0x766   :  { %890 = vmax.xlane.f32.xlu1 %v889_v51 }
 0x777   :  { %1708 = vrot.lane.b32.xlu1 %v1941_v16, %s1778_s24 }
 0x77b   :  { %1703 = vrot.lane.b32.xlu0 %v1941_v16, %s1777_s2 }
 0x77f   :  { %1001 = vrot.lane.b32.xlu0 %v797_v12, %s1779_s25 }
 0x7f2   :  { %v894_v52 = vpop.xlane.xlu0 %893 }
 0x7f3   :  { %v896_v53 = vsub.f32 %v886_v47, %v894_v52  ;;  %v891_v54 = vpop.xlane.xlu1 %890 }
 0x7f4   :  { %v895_v55 = vsub.f32 %v881_v49, %v891_v54 }
 0x7f5   :  { %v899_v56 = vmul.f32 1.442695, %v896_v53 }
 0x7f6   :  { %v897_v57 = vmul.f32 1.442695, %v895_v55  ;;  %v1704_v58 = vpop.permute.xlu0 %1703 }
 0x7f7   :  { %1733 = vpow2.f32 %v899_v56  ;;  %v1706_v59 = vunpack.i.h.bf16 %v1704_v58  ;;  %v1705_v60 = vunpack.i.l.bf16 %v1704_v58  ;;  %v1709_v61 = vpop.permute.xlu1 %1708 }
 0x7f8   :  { %v1711_v62 = vunpack.i.h.bf16 %v1709_v61  ;;  %v1710_v63 = vunpack.i.l.bf16 %v1709_v61  ;;  %1735 = vpow2.f32 %v897_v57 }
 0x7f9   :  { %v1638_v0 = vpack.c.bf16 %v1706_v59, %v1705_v60 }
 0x7fa   :  { %v1644_v1 = vpack.c.bf16 %v1711_v62, %v1710_v63  ;;  %v1002_v18 = vpop.permute.xlu0 %1001 }
 0x7fb   :  { %1640 = vmatprep.subr.msk.bf16.mxu1 %vm1893_vm7, %v1638_v0 }
 0x7fc   :  { %1643 = vmatpush3.bf16.msk.msra.mxu1 %vm1893_vm7, %v1638_v0 }
 0x7fd   :  { %1646 = vmatprep.subr.msk.bf16.mxu1 %vm1871_vm2, %v1644_v1 }
 0x801   :  { %v1734_v2 = vpop.eup %1733 }
 0x802   :  { %v904_v3 = vsel %vm233_vm3, %v1734_v2, 0.0  ;;  %v1736_v4 = vpop.eup %1735 }
 0x803   :  { %905 = vadd.xlane.f32.xlu1 %v904_v3  ;;  %v901_v5 = vsel %vm229_vm4, %v1736_v4, 0.0 }
 0x807   :  { %902 = vadd.xlane.f32.xlu1 %v901_v5 }
 0x818   :  { %999 = vrot.lane.b32.xlu1 %v1938_v15, %s1779_s25 }
 0x890   :  { %v906_v6 = vpop.xlane.xlu1 %905 }
 0x891   :  { %1737 = vrcp.f32 %v906_v6 }
 0x894   :  { %v903_v7 = vpop.xlane.xlu1 %902 }
 0x895   :  { %1739 = vrcp.f32 %v903_v7 }
 0x898   :  { %v1000_v14 = vpop.permute.xlu1 %999 }
 0x89b   :  { %v1738_v9 = vpop.eup %1737 }
 0x89c   :  { %v910_v12 = vmul.f32 %v1738_v9, %v1734_v2 }
 0x89f   :  { %v1740_v10 = vpop.eup %1739 }
 0x8a0   :  { %v908_v11 = vmul.f32 %v1740_v10, %v1736_v4 }
 0x8a2   :  { %1553 = vmatprep.mubr.msk.f32.mxu1 %vm229_vm4, %v908_v11 }
 0x8a3   :  { %1554 = vmatmul.mubr.msk.f32.vlgmr.msra.gmra.mrb[8].mxu1 %vm229_vm4, %v910_v12 }
 0x8a4   :  { %1649 = vmatpush3.bf16.xpose.msk.msra.mxu1 %vm1871_vm2, %v1644_v1  ;;  %1560 = vmatprep.mubr.msk.f32.mxu1 %vm145_vm1, %v1000_v14 }
 0x8ab   :  { %1561 = vmatmul.mubr.msk.f32.vlgmr.msra.gmra.mrb[10].mxu1 %vm145_vm1, %v1002_v18 }
 0x976   :  { %v1555_v15 = vpop.f32.mrb[8].mxu1 }
 0x977   :  { %v990_v21 = vpop.f32.mrb[9].mxu1 }
 0x97e   :  { %v1562_v22 = vpop.f32.mrb[10].mxu1 }
 0x97f   :  { %v1087_v13 = vadd.f32 %v1562_v22, %v1880_v19  ;;  %v1081_v8 = vpop.f32.mrb[11].mxu1 }
 0x980   :  { %v1082_v23 = vadd.f32 %v1081_v8, %v1882_v20 }
 0x981   :  { %v1093_v24 = vsel %vm233_vm3, %v1087_v13, -inf }
 0x982   :  { %1094 = vmax.xlane.f32.xlu0 %v1093_v24  ;;  %v1090_v25 = vsel %vm229_vm4, %v1082_v23, -inf }
 0x983   :  { %1091 = vmax.xlane.f32.xlu1 %v1090_v25 }
 0xa0f   :  { %v1095_v17 = vpop.xlane.xlu0 %1094 }
 0xa10   :  { %v1097_v27 = vsub.f32 %v1087_v13, %v1095_v17  ;;  %v1092_v28 = vpop.xlane.xlu1 %1091 }
 0xa11   :  { %v1096_v29 = vsub.f32 %v1082_v23, %v1092_v28 }
 0xa12   :  { %v1100_v30 = vmul.f32 1.442695, %v1097_v27 }
 0xa13   :  { %v1098_v31 = vmul.f32 1.442695, %v1096_v29 }
 0xa14   :  { %1741 = vpow2.f32 %v1100_v30 }
 0xa15   :  { %1743 = vpow2.f32 %v1098_v31 }
 0xa1e   :  { %v1742_v32 = vpop.eup %1741 }
 0xa1f   :  { %v1744_v34 = vpop.eup %1743  ;;  %v1105_v19 = vsel %vm233_vm3, %v1742_v32, 0.0 }
 0xa20   :  { %1106 = vadd.xlane.f32.xlu1 %v1105_v19  ;;  %v1102_v20 = vsel %vm229_vm4, %v1744_v34, 0.0 }
 0xa21   :  { %1103 = vadd.xlane.f32.xlu0 %v1102_v20 }
 0xa37   :  { %1713 = vrot.lane.b32.xlu0 %v1941_v16, %s1781_s0 }
 0xaad   :  { %v1107_v35 = vpop.xlane.xlu1 %1106 }
 0xaae   :  { %1745 = vrcp.f32 %v1107_v35  ;;  %v1104_v37 = vpop.xlane.xlu0 %1103 }
 0xaaf   :  { %1747 = vrcp.f32 %v1104_v37 }
 0xab2   :  { %v1714_v38 = vpop.permute.xlu0 %1713 }
 0xab3   :  { %v1716_v39 = vunpack.i.h.bf16 %v1714_v38  ;;  %v1715_v40 = vunpack.i.l.bf16 %v1714_v38 }
 0xab5   :  { %v1650_v42 = vpack.c.bf16 %v1716_v39, %v1715_v40 }
 0xab7   :  { %1652 = vmatprep.subr.msk.bf16.mxu0 %vm1893_vm7, %v1650_v42 }
 0xab8   :  { %v1746_v43 = vpop.eup %1745  ;;  %1655 = vmatpush3.bf16.msk.msra.mxu0 %vm1893_vm7, %v1650_v42 }
 0xab9   :  { %v1748_v44 = vpop.eup %1747  ;;  %1657 = vmatprep.subr.bf16.mxu0 %v1951_v26  ;;  %v1111_v16 = vmul.f32 %v1746_v43, %v1742_v32 }
 0xaba   :  { %v1109_v45 = vmul.f32 %v1748_v44, %v1744_v34 }
 0xabc   :  { %1567 = vmatprep.mubr.msk.f32.mxu0 %vm229_vm4, %v1109_v45 }
 0xabd   :  { %1568 = vmatmul.mubr.msk.f32.vlgmr.msra.gmra.mrb[8].mxu0 %vm229_vm4, %v1111_v16 }
 0xabe   :  { %1659 = vmatpush3.bf16.msra.mxu0 %v1951_v26 }
 0xabf   :  { %1661 = vmatprep.subr.bf16.mxu0 %v1967_v33 }
 0xb90   :  { %v1569_v46 = vpop.f32.mrb[8].mxu0 }
 0xb91   :  { %v1191_v47 = vpop.f32.mrb[9].mxu0 }
 0xb92   :  { %1574 = vmatprep.mubr.msk.f32.mxu0 %vm145_vm1, %v1191_v47 }
 0xb93   :  { %1575 = vmatmul.mubr.msk.f32.vlgmr.msra.gmra.mrb[10].mxu0 %vm145_vm1, %v1569_v46 }
 0xb94   :  { %1663 = vmatpush3.bf16.msra.mxu0 %v1967_v33  ;;  %1581 = vmatprep.mubr.msk.f32.mxu0 %vm145_vm1, %v990_v21 }
 0xb9b   :  { %1582 = vmatmul.mubr.msk.f32.vlgmr.msra.gmra.mrb[10].mxu0 %vm145_vm1, %v1555_v15 }
 0xc6e   :  { %v1583_v36 = vpop.f32.mrb[10].mxu0 }
 0xc6f   :  { %v1363_v48 = vadd.f32 %v1583_v36, %v1987_v41  ;;  %v1353_v49 = vpop.f32.mrb[11].mxu0 }
 0xc70   :  { %v1362_v26 = vadd.f32 %v1987_v41, %v1353_v49 }
 0xc71   :  { %1417 = vst.msk [vmem:[%s2062_s6 + $0x18] sm:$0xf] %vm714_vm8, %v1363_v48 }
 0xc72   :  { %1416 = vst.msk [vmem:[%s2062_s6 + $0x10] sm:$0xff] %vm57_vm0, %v1362_v26 }
 0xc73   :  { %1371 = vsyncpa [#allocation3], 1 }

</bundles_post_ra>
